<compile_context>
chip_gen: v7x
topology: tpu7x:2x2x1
jax: 0.10.0
libtpu: 0.0.40
codegen_flags: <defaults>
</compile_context>

<pallas_src>
import jax
import jax.numpy as jnp
from jax.experimental import pallas as pl
from jax.experimental.pallas import tpu as pltpu

NUM_CLASSES = 10
PAD_CLASSES = 128       # lane-dense logits width
NEG_PAD = -1e30         # bias for padded classes -> exp() underflows to 0


def lenet_kernel(x_ref, w1_ref, b1_ref, w2_ref, b2_ref, w3_ref, b3_ref, o_ref):
    # fc1 + ReLU   (TB,784)bf16 @ (784,300)bf16 -> f32
    h1 = jnp.dot(x_ref[...], w1_ref[...], preferred_element_type=jnp.float32)
    h1 = jnp.maximum(h1 + b1_ref[...], 0.0)

    # fc2 + ReLU   (TB,300) @ (300,100) -> f32
    h2 = jnp.dot(h1.astype(w2_ref.dtype), w2_ref[...],
                 preferred_element_type=jnp.float32)
    h2 = jnp.maximum(h2 + b2_ref[...], 0.0)

    # fc3          (TB,100) @ (100,128) -> f32 ; padded cols get NEG_PAD bias
    logits = jnp.dot(h2.astype(w3_ref.dtype), w3_ref[...],
                     preferred_element_type=jnp.float32)
    logits = logits + b3_ref[...]

    # log_softmax along dim=1 (numerically stable; padded cols contribute 0)
    m = jnp.max(logits, axis=1, keepdims=True)
    shifted = logits - m
    lse = jnp.log(jnp.sum(jnp.exp(shifted), axis=1, keepdims=True))
    o_ref[...] = shifted - lse


def _pick_tb(batch):
    """Batch tile: 256 (v6e/v7x MXU row multiple, VMEM-safe everywhere incl.
    v5e's 16 MiB scope with bf16 x), else the batch rounded up to a sublane
    multiple of 8 for small batches."""
    if batch >= 256:
        return 256
    return max(8, ((batch + 7) // 8) * 8)


def lenet_300_100_forward(x, params):
    """x: any shape whose trailing elements flatten to 784 per example (NCHW ok)."""
    w1, b1, w2, b2, w3, b3 = params
    x2d = x.reshape(-1, 784)
    B = x2d.shape[0]

    TB = _pick_tb(B)
    n_tiles = pl.cdiv(B, TB)
    B_pad = n_tiles * TB

    # --- host-side prep: bf16 matmul inputs, lane-dense fc3, row padding ---
    x_b = x2d.astype(jnp.bfloat16)
    if B_pad != B:
        x_b = jnp.pad(x_b, ((0, B_pad - B), (0, 0)))

    w1_b = w1.astype(jnp.bfloat16)
    w2_b = w2.astype(jnp.bfloat16)
    w3_b = (jnp.zeros((100, PAD_CLASSES), jnp.bfloat16)
            .at[:, :NUM_CLASSES].set(w3.astype(jnp.bfloat16)))

    b1_f = b1.astype(jnp.float32).reshape(1, 300)
    b2_f = b2.astype(jnp.float32).reshape(1, 100)
    b3_f = (jnp.full((1, PAD_CLASSES), NEG_PAD, jnp.float32)
            .at[:, :NUM_CLASSES].set(b3.astype(jnp.float32).reshape(1, NUM_CLASSES)))

    const = lambda shape: pl.BlockSpec(shape, lambda i: (0, 0))

    flops = 2 * B_pad * (784 * 300 + 300 * 100 + 100 * PAD_CLASSES)
    bytes_accessed = (
        B_pad * 784 * 2                                       # x (bf16)
        + (784 * 300 + 300 * 100 + 100 * PAD_CLASSES) * 2     # weights (bf16)
        + (300 + 100 + PAD_CLASSES) * 4                       # biases (f32)
        + B_pad * PAD_CLASSES * 4                             # output (f32)
    )

    out_pad = pl.pallas_call(
        lenet_kernel,
        out_shape=jax.ShapeDtypeStruct((B_pad, PAD_CLASSES), jnp.float32),
        grid=(n_tiles,),
        in_specs=[
            pl.BlockSpec((TB, 784), lambda i: (i, 0)),   # x: streamed per tile
            const((784, 300)), const((1, 300)),          # fc1 (VMEM-resident)
            const((300, 100)), const((1, 100)),          # fc2
            const((100, PAD_CLASSES)), const((1, PAD_CLASSES)),  # fc3 (padded)
        ],
        out_specs=pl.BlockSpec((TB, PAD_CLASSES), lambda i: (i, 0)),
        compiler_params=pltpu.CompilerParams(
            dimension_semantics=("parallel",),   # megacore sharding on v7x
        ),
        cost_estimate=pl.CostEstimate(
            flops=flops,
            transcendentals=B_pad * PAD_CLASSES,
            bytes_accessed=bytes_accessed,
        ),
    )(x_b, w1_b, b1_f, w2_b, b2_f, w3_b, b3_f)

    return out_pad[:B, :NUM_CLASSES]


def init_params(key):
    """Deterministic init; shapes mirror nn.Linear(784,300), (300,100), (100,10).

    Weights are stored as (in, out) = W.T so the kernel computes x @ W + b,
    semantically identical to torch's x @ W_torch.T + b.
    """
    ks = jax.random.split(key, 6)

    def linear(kw, kb, fan_in, fan_out):
        bound = 1.0 / jnp.sqrt(fan_in)  # matches torch's default init bound
        w = jax.random.uniform(kw, (fan_in, fan_out), jnp.float32, -bound, bound)
        b = jax.random.uniform(kb, (1, fan_out), jnp.float32, -bound, bound)
        return w, b

    w1, b1 = linear(ks[0], ks[1], 784, 300)
    w2, b2 = linear(ks[2], ks[3], 300, 100)
    w3, b3 = linear(ks[4], ks[5], 100, 10)
    return (w1, b1, w2, b2, w3, b3)


if __name__ == "__main__":
    key = jax.random.PRNGKey(0)
    k_x, k_p = jax.random.split(key)

    # MNIST-like NCHW input: (batch=8, channels=1, 28, 28) -> view(-1, 784)
    x = jax.random.normal(k_x, (8, 1, 28, 28), jnp.float32)
    params = init_params(k_p)

    out = lenet_300_100_forward(x, params)
    out = jax.block_until_ready(out)

    # sanity: log_softmax rows must (log-)sum to ~1 and shape must be (B, 10)
    assert out.shape == (8, 10), out.shape
    row_sums = jnp.sum(jnp.exp(out), axis=1)
    assert jnp.allclose(row_sums, 1.0, atol=1e-4), row_sums

    print("KERNEL_OK")
</pallas_src>

<mosaic_0001>
module attributes {stable_mosaic.version = 11 : i64} {
  func.func @lenet_kernel(%arg0: i32, %arg1: memref<8x784xbf16, #tpu.memory_space<vmem>>, %arg2: memref<784x300xbf16, #tpu.memory_space<vmem>>, %arg3: memref<1x300xf32, #tpu.memory_space<vmem>>, %arg4: memref<300x100xbf16, #tpu.memory_space<vmem>>, %arg5: memref<1x100xf32, #tpu.memory_space<vmem>>, %arg6: memref<100x128xbf16, #tpu.memory_space<vmem>>, %arg7: memref<1x128xf32, #tpu.memory_space<vmem>>, %arg8: memref<8x128xf32, #tpu.memory_space<vmem>>) attributes {dimension_semantics = [#tpu.dimension_semantics<parallel>], iteration_bounds = array<i64: 1>, scalar_prefetch = 0 : i64, scratch_operands = 0 : i64, tpu.core_type = #tpu.core_type<tc>, window_params = [{transform_indices = @transform_0, window_bounds = array<i64: 8, 784>}, {pipeline_mode = #tpu.pipeline_mode<synchronous>, transform_indices = @transform_1, window_bounds = array<i64: 784, 300>}, {pipeline_mode = #tpu.pipeline_mode<synchronous>, transform_indices = @transform_2, window_bounds = array<i64: 1, 300>}, {pipeline_mode = #tpu.pipeline_mode<synchronous>, transform_indices = @transform_3, window_bounds = array<i64: 300, 100>}, {pipeline_mode = #tpu.pipeline_mode<synchronous>, transform_indices = @transform_4, window_bounds = array<i64: 1, 100>}, {pipeline_mode = #tpu.pipeline_mode<synchronous>, transform_indices = @transform_5, window_bounds = array<i64: 100, 128>}, {pipeline_mode = #tpu.pipeline_mode<synchronous>, transform_indices = @transform_6, window_bounds = array<i64: 1, 128>}, {transform_indices = @transform_7, window_bounds = array<i64: 8, 128>}]} {
    %c0 = arith.constant 0 : index
    %c0_0 = arith.constant 0 : index
    %0 = vector.load %arg1[%c0, %c0_0] : memref<8x784xbf16, #tpu.memory_space<vmem>>, vector<8x784xbf16>
    %c0_1 = arith.constant 0 : index
    %c0_2 = arith.constant 0 : index
    %1 = vector.load %arg2[%c0_1, %c0_2] : memref<784x300xbf16, #tpu.memory_space<vmem>>, vector<784x300xbf16>
    %cst = arith.constant dense<0.000000e+00> : vector<8x300xf32>
    %2 = tpu.matmul %0, %1, %cst {dimension_numbers = #tpu.dot_dimension_numbers<[1], [0], [0], [1], [0, 0, 1, 1], [], []>} : vector<8x784xbf16>, vector<784x300xbf16>, vector<8x300xf32> -> vector<8x300xf32>
    %c0_3 = arith.constant 0 : index
    %c0_4 = arith.constant 0 : index
    %3 = vector.load %arg3[%c0_3, %c0_4] : memref<1x300xf32, #tpu.memory_space<vmem>>, vector<1x300xf32>
    %4 = vector.broadcast %3 : vector<1x300xf32> to vector<8x300xf32>
    %5 = arith.addf %2, %4 : vector<8x300xf32>
    %cst_5 = arith.constant 0.000000e+00 : f32
    %6 = vector.broadcast %cst_5 : f32 to vector<8x300xf32>
    %7 = arith.maximumf %5, %6 : vector<8x300xf32>
    %8 = arith.truncf %7 : vector<8x300xf32> to vector<8x300xbf16>
    %c0_6 = arith.constant 0 : index
    %c0_7 = arith.constant 0 : index
    %9 = vector.load %arg4[%c0_6, %c0_7] : memref<300x100xbf16, #tpu.memory_space<vmem>>, vector<300x100xbf16>
    %cst_8 = arith.constant dense<0.000000e+00> : vector<8x100xf32>
    %10 = tpu.matmul %8, %9, %cst_8 {dimension_numbers = #tpu.dot_dimension_numbers<[1], [0], [0], [1], [0, 0, 1, 1], [], []>} : vector<8x300xbf16>, vector<300x100xbf16>, vector<8x100xf32> -> vector<8x100xf32>
    %c0_9 = arith.constant 0 : index
    %c0_10 = arith.constant 0 : index
    %11 = vector.load %arg5[%c0_9, %c0_10] : memref<1x100xf32, #tpu.memory_space<vmem>>, vector<1x100xf32>
    %12 = vector.broadcast %11 : vector<1x100xf32> to vector<8x100xf32>
    %13 = arith.addf %10, %12 : vector<8x100xf32>
    %cst_11 = arith.constant 0.000000e+00 : f32
    %14 = vector.broadcast %cst_11 : f32 to vector<8x100xf32>
    %15 = arith.maximumf %13, %14 : vector<8x100xf32>
    %16 = arith.truncf %15 : vector<8x100xf32> to vector<8x100xbf16>
    %c0_12 = arith.constant 0 : index
    %c0_13 = arith.constant 0 : index
    %17 = vector.load %arg6[%c0_12, %c0_13] : memref<100x128xbf16, #tpu.memory_space<vmem>>, vector<100x128xbf16>
    %cst_14 = arith.constant dense<0.000000e+00> : vector<8x128xf32>
    %18 = tpu.matmul %16, %17, %cst_14 {dimension_numbers = #tpu.dot_dimension_numbers<[1], [0], [0], [1], [0, 0, 1, 1], [], []>} : vector<8x100xbf16>, vector<100x128xbf16>, vector<8x128xf32> -> vector<8x128xf32>
    %c0_15 = arith.constant 0 : index
    %c0_16 = arith.constant 0 : index
    %19 = vector.load %arg7[%c0_15, %c0_16] : memref<1x128xf32, #tpu.memory_space<vmem>>, vector<1x128xf32>
    %20 = vector.broadcast %19 : vector<1x128xf32> to vector<8x128xf32>
    %21 = arith.addf %18, %20 : vector<8x128xf32>
    %cst_17 = arith.constant dense<0xFF800000> : vector<8xf32>
    %22 = vector.multi_reduction <maximumf>, %21, %cst_17 [1] : vector<8x128xf32> to vector<8xf32>
    %23 = vector.shape_cast %22 : vector<8xf32> to vector<8x1xf32>
    %24 = vector.broadcast %23 : vector<8x1xf32> to vector<8x128xf32>
    %25 = arith.subf %21, %24 : vector<8x128xf32>
    %26 = math.exp %25 : vector<8x128xf32>
    %cst_18 = arith.constant dense<0.000000e+00> : vector<8xf32>
    %27 = vector.multi_reduction <add>, %26, %cst_18 [1] : vector<8x128xf32> to vector<8xf32>
    %28 = vector.shape_cast %27 : vector<8xf32> to vector<8x1xf32>
    %29 = math.log %28 : vector<8x1xf32>
    %30 = vector.broadcast %29 : vector<8x1xf32> to vector<8x128xf32>
    %31 = arith.subf %25, %30 : vector<8x128xf32>
    %c0_19 = arith.constant 0 : index
    %c0_20 = arith.constant 0 : index
    %32 = vector.load %arg8[%c0_19, %c0_20] : memref<8x128xf32, #tpu.memory_space<vmem>>, vector<8x128xf32>
    tpu.vector_store %arg8[%c0_19, %c0_20], %31 {strides = array<i32>} : memref<8x128xf32, #tpu.memory_space<vmem>>, vector<8x128xf32>,
    return
  }
  func.func @transform_0(%arg0: i32) -> (i32, i32) {
    %c0_i32 = arith.constant 0 : i32
    %c0_i32_0 = arith.constant 0 : i32
    return %arg0, %c0_i32 : i32, i32
  }
  func.func @transform_1(%arg0: i32) -> (i32, i32) {
    %c0_i32 = arith.constant 0 : i32
    %c0_i32_0 = arith.constant 0 : i32
    %c0_i32_1 = arith.constant 0 : i32
    return %c0_i32, %c0_i32_0 : i32, i32
  }
  func.func @transform_2(%arg0: i32) -> (i32, i32) {
    %c0_i32 = arith.constant 0 : i32
    %c0_i32_0 = arith.constant 0 : i32
    %c0_i32_1 = arith.constant 0 : i32
    return %c0_i32, %c0_i32_0 : i32, i32
  }
  func.func @transform_3(%arg0: i32) -> (i32, i32) {
    %c0_i32 = arith.constant 0 : i32
    %c0_i32_0 = arith.constant 0 : i32
    %c0_i32_1 = arith.constant 0 : i32
    return %c0_i32, %c0_i32_0 : i32, i32
  }
  func.func @transform_4(%arg0: i32) -> (i32, i32) {
    %c0_i32 = arith.constant 0 : i32
    %c0_i32_0 = arith.constant 0 : i32
    %c0_i32_1 = arith.constant 0 : i32
    return %c0_i32, %c0_i32_0 : i32, i32
  }
  func.func @transform_5(%arg0: i32) -> (i32, i32) {
    %c0_i32 = arith.constant 0 : i32
    %c0_i32_0 = arith.constant 0 : i32
    %c0_i32_1 = arith.constant 0 : i32
    return %c0_i32, %c0_i32_0 : i32, i32
  }
  func.func @transform_6(%arg0: i32) -> (i32, i32) {
    %c0_i32 = arith.constant 0 : i32
    %c0_i32_0 = arith.constant 0 : i32
    %c0_i32_1 = arith.constant 0 : i32
    return %c0_i32, %c0_i32_0 : i32, i32
  }
  func.func @transform_7(%arg0: i32) -> (i32, i32) {
    %c0_i32 = arith.constant 0 : i32
    %c0_i32_0 = arith.constant 0 : i32
    return %arg0, %c0_i32 : i32, i32
  }
}

</mosaic_0001>

<bundles_post_ra>
// kernel: tpu_custom_call.1
= control target key start
LH: loop header
LB: loop body
LE: loop exit
PB: predicated region body
PF: predicated region fallthrough
CT: control target
= control target key end

     0   :  { %v2362_v2 = vmov 0   ;;  %vm1053_vm0 = vcmask 130048   ;;  %vm2364_vm1 = vmmov 0   ;;  %s2989_s0 = inlined_call_operand.vmem [shape: bf16[8,784], index: 0, kind: input, shape index: {}]   ;;  %s2990_s1 = inlined_call_operand.vmem [shape: bf16[784,300], index: 1, kind: input, shape index: {}]   ;;  %s2991_s2 = inlined_call_operand.vmem [shape: f32[1,300], index: 2, kind: input, shape index: {}]   ;;  %s2992_s3 = inlined_call_operand.vmem [shape: bf16[300,100], index: 3, kind: input, shape index: {}]   ;;  %s2993_s4 = inlined_call_operand.vmem [shape: f32[1,100], index: 4, kind: input, shape index: {}]   ;;  %s2994_s5 = inlined_call_operand.vmem [shape: bf16[100,128], index: 5, kind: input, shape index: {}]   ;;  %s2995_s6 = inlined_call_operand.vmem [shape: f32[1,128], index: 6, kind: input, shape index: {}]   ;;  %s2996_s7 = inlined_call_operand.hbm [shape: f32[8,128], index: 7, kind: output, shape index: {}]  }
   0x1   :  { %v2105_v0 = vld [vmem:[%s2990_s1 + $0x4] ss:$12 sps:$4 sm:$0xff]   ;;  %v2107_v1 = vld [vmem:[%s2990_s1] ss:$12 sps:$4 sm:$0xff]   ;;  %1212 = vmatprep.mubr.bf16.mxu1 %v2362_v2  ;;  %v2108_v3 = vld [vmem:[%s2990_s1 + $0x1c] ss:$12 sps:$4 sm:$0xff]  }
   0x2   :  { %1057 = vmatprep.subr.bf16.mxu0 %v2105_v0  ;;  %v2110_v4 = vld [vmem:[%s2990_s1 + $0x18] ss:$12 sps:$4 sm:$0xff]   ;;  %v2111_v5 = vld [vmem:[%s2990_s1 + $0x34] ss:$12 sps:$4 sm:$0xff]   ;;  %v2113_v6 = vld [vmem:[%s2990_s1 + $0x30] ss:$12 sps:$4 sm:$0xff]  }
   0x3   :  { %1058 = vmatpush1.bf16.msra.mxu0 %v2107_v1  ;;  %v2114_v7 = vld [vmem:[%s2990_s1 + $0x4c] ss:$12 sps:$4 sm:$0xff]   ;;  %v2116_v8 = vld [vmem:[%s2990_s1 + $0x48] ss:$12 sps:$4 sm:$0xff]   ;;  %v2117_v9 = vld [vmem:[%s2990_s1 + $0x64] ss:$12 sps:$4 sm:$0xff]  }
   0x4   :  { %1059 = vmatprep.subr.bf16.mxu0 %v2108_v3  ;;  %v2132_v10 = vld [vmem:[%s2990_s1 + $0x484] ss:$12 sps:$4 sm:$0xff]   ;;  %v2119_v11 = vld [vmem:[%s2990_s1 + $0x60] ss:$12 sps:$4 sm:$0xff]   ;;  %v2138_v13 = vld [vmem:[%s2990_s1 + $0xc8] ss:$12 sps:$4 sm:$0xff]  }
   0x5   :  { %1180 = vmatprep.subr.bf16.mxu1 %v2132_v10  ;;  %v2136_v12 = vld [vmem:[%s2990_s1 + $0x480] ss:$12 sps:$4 sm:$0xff]   ;;  %v2120_v14 = vld [vmem:[%s2990_s1 + $0x7c] ss:$12 sps:$4 sm:$0xff]   ;;  %v2451_v15 = vld [vmem:[%s2989_s0 + $0x18] ss:$0 sps:$4 sm:$0xff]  }
   0x6   :  { %1181 = vmatpush1.bf16.msra.mxu1 %v2136_v12  ;;  %v2122_v16 = vld [vmem:[%s2990_s1 + $0x78] ss:$12 sps:$4 sm:$0xff]   ;;  %v2142_v17 = vld [vmem:[%s2990_s1 + $0x8] ss:$12 sps:$4 sm:$0xff]   ;;  %v2144_v18 = vld [vmem:[%s2990_s1 + $0xe0] ss:$12 sps:$4 sm:$0xff]  }
   0x7   :  { %1060 = vmatpush1.bf16.msra.mxu0 %v2110_v4  ;;  %1953 = vmatprep.subr.bf16.mxu1 %v2138_v13  ;;  %v2123_v19 = vld [vmem:[%s2990_s1 + $0x94] ss:$12 sps:$4 sm:$0xff]   ;;  %v2125_v20 = vld [vmem:[%s2990_s1 + $0x90] ss:$12 sps:$4 sm:$0xff]   ;;  %v2149_v22 = vld [vmem:[%s2990_s1 + $0xf8] ss:$12 sps:$4 sm:$0xff]  }
   0x8   :  { %1061 = vmatprep.subr.bf16.mxu0 %v2111_v5  ;;  %v2147_v21 = vld [vmem:[%s2990_s1 + $0x20] ss:$12 sps:$4 sm:$0xff]   ;;  %v2152_v24 = vld [vmem:[%s2990_s1 + $0x38] ss:$12 sps:$4 sm:$0xff]   ;;  %v2154_v25 = vld [vmem:[%s2990_s1 + $0x110] ss:$12 sps:$4 sm:$0xff]  }
   0x9   :  { %1921 = vmatmul.mubr.msk.bf16.vlgmr.msra.gmra.mrb[0].mxu1 %vm1053_vm0, %v2451_v15  ;;  %v2126_v23 = vld [vmem:[%s2990_s1 + $0xac] ss:$12 sps:$4 sm:$0xff]   ;;  %v2128_v26 = vld [vmem:[%s2990_s1 + $0xa8] ss:$12 sps:$4 sm:$0xff]   ;;  %v2129_v27 = vld [vmem:[%s2990_s1 + $0xc4] ss:$12 sps:$4 sm:$0xff]  }
   0xa   :  { %1954 = vmatpush3.bf16.msra.mxu1 %v2142_v17  ;;  %v2157_v28 = vld [vmem:[%s2990_s1 + $0x50] ss:$12 sps:$4 sm:$0xff]   ;;  %v2159_v29 = vld [vmem:[%s2990_s1 + $0x128] ss:$12 sps:$4 sm:$0xff]   ;;  %v2131_v30 = vld [vmem:[%s2990_s1 + $0xc0] ss:$12 sps:$4 sm:$0xff]  }
   0xb   :  { %1062 = vmatpush1.bf16.msra.mxu0 %v2113_v6  ;;  %1955 = vmatprep.subr.bf16.mxu1 %v2144_v18  ;;  %v2134_v31 = vld [vmem:[%s2990_s1 + $0xdc] ss:$12 sps:$4 sm:$0xff]   ;;  %v2164_v33 = vld [vmem:[%s2990_s1 + $0x140] ss:$12 sps:$4 sm:$0xff]   ;;  %v2137_v34 = vld [vmem:[%s2990_s1 + $0xd8] ss:$12 sps:$4 sm:$0xff]  }
   0xc   :  { %1063 = vmatprep.subr.bf16.mxu0 %v2114_v7  ;;  %v2162_v32 = vld [vmem:[%s2990_s1 + $0x68] ss:$12 sps:$4 sm:$0xff]   ;;  %v2167_v36 = vld [vmem:[%s2990_s1 + $0x80] ss:$12 sps:$4 sm:$0xff]   ;;  %v2169_v38 = vld [vmem:[%s2990_s1 + $0x158] ss:$12 sps:$4 sm:$0xff]  }
   0xd   :  { %v2139_v35 = vld [vmem:[%s2990_s1 + $0xf4] ss:$12 sps:$4 sm:$0xff]   ;;  %v2143_v40 = vld [vmem:[%s2990_s1 + $0xf0] ss:$12 sps:$4 sm:$0xff]   ;;  %v2145_v41 = vld [vmem:[%s2990_s1 + $0x10c] ss:$12 sps:$4 sm:$0xff]  }
   0xe   :  { %1956 = vmatpush3.bf16.msra.mxu1 %v2147_v21  ;;  %v28_v37 = vld [vmem:[%s2989_s0] sm:$0xff]  ;;  %v2176_v43 = vld [vmem:[%s2990_s1 + $0x170] ss:$12 sps:$4 sm:$0xff]   ;;  %v2148_v44 = vld [vmem:[%s2990_s1 + $0x108] ss:$12 sps:$4 sm:$0xff]  }
   0xf   :  { %1064 = vmatpush1.bf16.msra.mxu0 %v2116_v8  ;;  %1957 = vmatprep.subr.bf16.mxu1 %v2149_v22  ;;  %v1768_v39 = vcombine.high %v28_v37, %v28_v37  ;;  %v2175_v42 = vld [vmem:[%s2990_s1 + $0x98] ss:$12 sps:$4 sm:$0xff]   ;;  %v2180_v46 = vld [vmem:[%s2990_s1 + $0xb0] ss:$12 sps:$4 sm:$0xff]   ;;  %v2181_v47 = vld [vmem:[%s2990_s1 + $0x248] ss:$12 sps:$4 sm:$0xff]   ;;  %v1767_v51 = vcombine.low %v28_v37, %v28_v37 }
  0x10   :  { %1065 = vmatprep.subr.bf16.mxu0 %v2117_v9  ;;  %v2150_v45 = vld [vmem:[%s2990_s1 + $0x124] ss:$12 sps:$4 sm:$0xff]   ;;  %v2153_v48 = vld [vmem:[%s2990_s1 + $0x120] ss:$12 sps:$4 sm:$0xff]   ;;  %v2155_v49 = vld [vmem:[%s2990_s1 + $0x13c] ss:$12 sps:$4 sm:$0xff]  }
  0x11   :  { %1089 = vmatprep.mubr.bf16.mxu0 %v1768_v39  ;;  %1253 = vmatprep.mubr.bf16.mxu1 %v1768_v39  ;;  %v2185_v50 = vld [vmem:[%s2990_s1 + $0x188] ss:$12 sps:$4 sm:$0xff]   ;;  %v2186_v52 = vld [vmem:[%s2990_s1 + $0x260] ss:$12 sps:$4 sm:$0xff]   ;;  %v2158_v53 = vld [vmem:[%s2990_s1 + $0x138] ss:$12 sps:$4 sm:$0xff]  }
  0x12   :  { %1958 = vmatpush3.bf16.msra.mxu1 %v2152_v24  ;;  %v2160_v54 = vld [vmem:[%s2990_s1 + $0x154] ss:$12 sps:$4 sm:$0xff]   ;;  %v2191_v56 = vld [vmem:[%s2990_s1 + $0x278] ss:$12 sps:$4 sm:$0xff]   ;;  %v2163_v57 = vld [vmem:[%s2990_s1 + $0x150] ss:$12 sps:$4 sm:$0xff]  }
  0x13   :  { %1066 = vmatpush1.bf16.msra.mxu0 %v2119_v11  ;;  %1959 = vmatprep.subr.bf16.mxu1 %v2154_v25  ;;  %v2190_v55 = vld [vmem:[%s2990_s1 + $0x1a0] ss:$12 sps:$4 sm:$0xff]   ;;  %v2195_v59 = vld [vmem:[%s2990_s1 + $0x1b8] ss:$12 sps:$4 sm:$0xff]   ;;  %v2196_v60 = vld [vmem:[%s2990_s1 + $0x290] ss:$12 sps:$4 sm:$0xff]  }
  0x14   :  { %1067 = vmatprep.subr.bf16.mxu0 %v2120_v14  ;;  %v2165_v58 = vld [vmem:[%s2990_s1 + $0x16c] ss:$12 sps:$4 sm:$0xff]   ;;  %v2168_v61 = vld [vmem:[%s2990_s1 + $0x168] ss:$12 sps:$4 sm:$0xff]   ;;  %v2174_v62 = vld [vmem:[%s2990_s1 + $0x184] ss:$12 sps:$4 sm:$0xff]  }
  0x15   :  { %v2200_v63 = vld [vmem:[%s2990_s1 + $0x1d0] ss:$12 sps:$4 sm:$0xff]   ;;  %v2201_v0 = vld [vmem:[%s2990_s1 + $0x2a8] ss:$12 sps:$4 sm:$0xff]   ;;  %v2172_v1 = vld [vmem:[%s2990_s1 + $0x180] ss:$12 sps:$4 sm:$0xff]  }
  0x16   :  { %1960 = vmatpush3.bf16.msra.mxu1 %v2157_v28  ;;  %v2179_v2 = vld [vmem:[%s2990_s1 + $0x19c] ss:$12 sps:$4 sm:$0xff]   ;;  %v2206_v4 = vld [vmem:[%s2990_s1 + $0x2c0] ss:$12 sps:$4 sm:$0xff]   ;;  %v2177_v5 = vld [vmem:[%s2990_s1 + $0x198] ss:$12 sps:$4 sm:$0xff]  }
  0x17   :  { %1068 = vmatpush1.bf16.msra.mxu0 %v2122_v16  ;;  %1961 = vmatprep.subr.bf16.mxu1 %v2159_v29  ;;  %v2205_v3 = vld [vmem:[%s2990_s1 + $0x1e8] ss:$12 sps:$4 sm:$0xff]   ;;  %v2210_v7 = vld [vmem:[%s2990_s1 + $0x200] ss:$12 sps:$4 sm:$0xff]   ;;  %v2211_v8 = vld [vmem:[%s2990_s1 + $0x2d8] ss:$12 sps:$4 sm:$0xff]  }
  0x18   :  { %1069 = vmatprep.subr.bf16.mxu0 %v2123_v19  ;;  %v2184_v6 = vld [vmem:[%s2990_s1 + $0x1b4] ss:$12 sps:$4 sm:$0xff]   ;;  %v29_v9 = vld [vmem:[%s2989_s0 + $0x8] sm:$0xff]  ;;  %v2182_v11 = vld [vmem:[%s2990_s1 + $0x1b0] ss:$12 sps:$4 sm:$0xff]  }
  0x19   :  { %v1770_v10 = vcombine.high %v29_v9, %v29_v9  ;;  %v2189_v12 = vld [vmem:[%s2990_s1 + $0x1cc] ss:$12 sps:$4 sm:$0xff]   ;;  %v2216_v14 = vld [vmem:[%s2990_s1 + $0x2f0] ss:$12 sps:$4 sm:$0xff]   ;;  %v2187_v16 = vld [vmem:[%s2990_s1 + $0x1c8] ss:$12 sps:$4 sm:$0xff]   ;;  %v2653_v22 = vcombine.low %v29_v9, %v29_v9 }
  0x1a   :  { %1962 = vmatpush3.bf16.msra.mxu1 %v2162_v32  ;;  %v2215_v13 = vld [vmem:[%s2990_s1 + $0x218] ss:$12 sps:$4 sm:$0xff]   ;;  %v2220_v18 = vld [vmem:[%s2990_s1 + $0x230] ss:$12 sps:$4 sm:$0xff]   ;;  %v2223_v19 = vld [vmem:[%s2990_s1 + $0x3c8] ss:$12 sps:$4 sm:$0xff]  }
  0x1b   :  { %1070 = vmatpush1.bf16.msra.mxu0 %v2125_v20  ;;  %1963 = vmatprep.subr.bf16.mxu1 %v2164_v33  ;;  %v2194_v17 = vld [vmem:[%s2990_s1 + $0x1e4] ss:$12 sps:$4 sm:$0xff]   ;;  %v2192_v20 = vld [vmem:[%s2990_s1 + $0x1e0] ss:$12 sps:$4 sm:$0xff]   ;;  %v2199_v21 = vld [vmem:[%s2990_s1 + $0x1fc] ss:$12 sps:$4 sm:$0xff]  }
  0x1c   :  { %1071 = vmatprep.subr.bf16.mxu0 %v2126_v23  ;;  %v2227_v23 = vld [vmem:[%s2990_s1 + $0x308] ss:$12 sps:$4 sm:$0xff]   ;;  %v2228_v24 = vld [vmem:[%s2990_s1 + $0x3e0] ss:$12 sps:$4 sm:$0xff]   ;;  %v2197_v25 = vld [vmem:[%s2990_s1 + $0x1f8] ss:$12 sps:$4 sm:$0xff]  }
  0x1d   :  { %v2233_v28 = vld [vmem:[%s2990_s1 + $0x3f8] ss:$12 sps:$4 sm:$0xff]   ;;  %v2202_v29 = vld [vmem:[%s2990_s1 + $0x210] ss:$12 sps:$4 sm:$0xff]   ;;  %v2207_v33 = vld [vmem:[%s2990_s1 + $0x228] ss:$12 sps:$4 sm:$0xff]  }
  0x1e   :  { %1964 = vmatpush3.bf16.msra.mxu1 %v2167_v36  ;;  %v2238_v32 = vld [vmem:[%s2990_s1 + $0x410] ss:$12 sps:$4 sm:$0xff]   ;;  %v2243_v36 = vld [vmem:[%s2990_s1 + $0x428] ss:$12 sps:$4 sm:$0xff]   ;;  %v2212_v37 = vld [vmem:[%s2990_s1 + $0x240] ss:$12 sps:$4 sm:$0xff]  }
  0x1f   :  { %1072 = vmatpush1.bf16.msra.mxu0 %v2128_v26  ;;  %1965 = vmatprep.subr.bf16.mxu1 %v2169_v38  ;;  %v2204_v26 = vld [vmem:[%s2990_s1 + $0x214] ss:$12 sps:$4 sm:$0xff]   ;;  %v2219_v38 = vld [vmem:[%s2990_s1 + $0x25c] ss:$12 sps:$4 sm:$0xff]  }
  0x20   :  { %1073 = vmatprep.subr.bf16.mxu0 %v2129_v27  ;;  %v2232_v27 = vld [vmem:[%s2990_s1 + $0x320] ss:$12 sps:$4 sm:$0xff]   ;;  %v2247_v39 = vld [vmem:[%s2990_s1 + $0x368] ss:$12 sps:$4 sm:$0xff]  }
  0x22   :  { %1966 = vmatpush3.bf16.msra.mxu1 %v2175_v42 }
  0x23   :  { %1074 = vmatpush1.bf16.msra.mxu0 %v2131_v30  ;;  %1967 = vmatprep.subr.bf16.mxu1 %v2176_v43  ;;  %v2209_v30 = vld [vmem:[%s2990_s1 + $0x22c] ss:$12 sps:$4 sm:$0xff]  }
  0x24   :  { %1075 = vmatprep.subr.bf16.mxu0 %v2134_v31  ;;  %v2237_v31 = vld [vmem:[%s2990_s1 + $0x338] ss:$12 sps:$4 sm:$0xff]  }
  0x25   :  { %v2217_v43 = vld [vmem:[%s2990_s1 + $0x258] ss:$12 sps:$4 sm:$0xff]  }
  0x26   :  { %1968 = vmatpush3.bf16.msra.mxu1 %v2180_v46  ;;  %v2253_v46 = vld [vmem:[%s2990_s1 + $0x458] ss:$12 sps:$4 sm:$0xff]  }
  0x27   :  { %1076 = vmatpush1.bf16.msra.mxu0 %v2137_v34  ;;  %1975 = vmatprep.subr.bf16.mxu1 %v2181_v47  ;;  %v2214_v34 = vld [vmem:[%s2990_s1 + $0x244] ss:$12 sps:$4 sm:$0xff]  }
  0x28   :  { %1077 = vmatprep.subr.bf16.mxu0 %v2139_v35  ;;  %v2242_v35 = vld [vmem:[%s2990_s1 + $0x350] ss:$12 sps:$4 sm:$0xff]  }
  0x29   :  { %1254 = vmatmul.mubr.bf16.vlgmr.msra.gmra.mrb[4].mxu1 %v1767_v51  ;;  %v2224_v47 = vld [vmem:[%s2990_s1 + $0x270] ss:$12 sps:$4 sm:$0xff]  }
  0x2a   :  { %1976 = vmatpush3.bf16.msra.mxu1 %v2185_v50  ;;  %1293 = vmatprep.mubr.bf16.mxu1 %v1770_v10  ;;  %v2258_v50 = vld [vmem:[%s2990_s1 + $0x470] ss:$12 sps:$4 sm:$0xff]  }
  0x2b   :  { %1078 = vmatpush1.bf16.msra.mxu0 %v2143_v40  ;;  %1977 = vmatprep.subr.bf16.mxu1 %v2186_v52  ;;  %v30_v40 = vld [vmem:[%s2989_s0 + $0x10] sm:$0xff] }
  0x2c   :  { %1079 = vmatprep.subr.bf16.mxu0 %v2145_v41  ;;  %v2248_v41 = vld [vmem:[%s2990_s1 + $0x440] ss:$12 sps:$4 sm:$0xff]   ;;  %v1772_v42 = vcombine.high %v30_v40, %v30_v40  ;;  %v2236_v52 = vld [vmem:[%s2990_s1 + $0x2a4] ss:$12 sps:$4 sm:$0xff]  }
  0x2e   :  { %1978 = vmatpush3.bf16.msra.mxu1 %v2190_v55  ;;  %v2241_v55 = vld [vmem:[%s2990_s1 + $0x2bc] ss:$12 sps:$4 sm:$0xff]  }
  0x2f   :  { %1080 = vmatpush1.bf16.msra.mxu0 %v2148_v44  ;;  %1979 = vmatprep.subr.bf16.mxu1 %v2191_v56  ;;  %v2226_v44 = vld [vmem:[%s2990_s1 + $0x274] ss:$12 sps:$4 sm:$0xff]   ;;  %v2752_v56 = vcombine.low %v30_v40, %v30_v40 }
  0x30   :  { %1081 = vmatprep.subr.bf16.mxu0 %v2150_v45  ;;  %v2252_v45 = vld [vmem:[%s2990_s1 + $0x380] ss:$12 sps:$4 sm:$0xff]  }
  0x32   :  { %1980 = vmatpush3.bf16.msra.mxu1 %v2195_v59  ;;  %v2239_v59 = vld [vmem:[%s2990_s1 + $0x2b8] ss:$12 sps:$4 sm:$0xff]  }
  0x33   :  { %1082 = vmatpush1.bf16.msra.mxu0 %v2153_v48  ;;  %1981 = vmatprep.subr.bf16.mxu1 %v2196_v60  ;;  %v2231_v48 = vld [vmem:[%s2990_s1 + $0x28c] ss:$12 sps:$4 sm:$0xff]   ;;  %v2246_v60 = vld [vmem:[%s2990_s1 + $0x2d4] ss:$12 sps:$4 sm:$0xff]  }
  0x34   :  { %1083 = vmatprep.subr.bf16.mxu0 %v2155_v49  ;;  %v2257_v49 = vld [vmem:[%s2990_s1 + $0x398] ss:$12 sps:$4 sm:$0xff]  }
  0x36   :  { %1982 = vmatpush3.bf16.msra.mxu1 %v2200_v63  ;;  %v2249_v63 = vld [vmem:[%s2990_s1 + $0x2e8] ss:$12 sps:$4 sm:$0xff]  }
  0x37   :  { %1084 = vmatpush1.bf16.msra.mxu0 %v2158_v53  ;;  %1983 = vmatprep.subr.bf16.mxu1 %v2201_v0  ;;  %v2262_v53 = vld [vmem:[%s2990_s1 + $0x3b0] ss:$12 sps:$4 sm:$0xff]  }
  0x38   :  { %1085 = vmatprep.subr.bf16.mxu0 %v2160_v54  ;;  %v2234_v54 = vld [vmem:[%s2990_s1 + $0x2a0] ss:$12 sps:$4 sm:$0xff]   ;;  %v2256_v0 = vld [vmem:[%s2990_s1 + $0x304] ss:$12 sps:$4 sm:$0xff]  }
  0x3a   :  { %1984 = vmatpush3.bf16.msra.mxu1 %v2205_v3  ;;  %v2259_v3 = vld [vmem:[%s2990_s1 + $0x318] ss:$12 sps:$4 sm:$0xff]  }
  0x3b   :  { %1086 = vmatpush1.bf16.msra.mxu0 %v2163_v57  ;;  %1985 = vmatprep.subr.bf16.mxu1 %v2206_v4  ;;  %v2271_v57 = vld [vmem:[%s2990_s1 + $0x488] ss:$12 sps:$4 sm:$0xff]  }
  0x3c   :  { %1087 = vmatprep.subr.bf16.mxu0 %v2165_v58  ;;  %v2363_v58 = vmov 0.0  }
  0x3e   :  { %1986 = vmatpush3.bf16.msra.mxu1 %v2210_v7 }
  0x3f   :  { %1088 = vmatpush1.bf16.msra.mxu0 %v2168_v61  ;;  %1987 = vmatprep.subr.bf16.mxu1 %v2211_v8  ;;  %v2244_v61 = vld [vmem:[%s2990_s1 + $0x2d0] ss:$12 sps:$4 sm:$0xff]  }
  0x40   :  { %1098 = vmatprep.subr.bf16.mxu0 %v2174_v62  ;;  %v2251_v62 = vld [vmem:[%s2990_s1 + $0x2ec] ss:$12 sps:$4 sm:$0xff]  }
  0x42   :  { %1090 = vmatmul.mubr.bf16.vlgmr.msra.gmra.mrb[0].mxu0 %v1767_v51  ;;  %1988 = vmatpush3.bf16.msra.mxu1 %v2215_v13  ;;  %v2229_v51 = vld [vmem:[%s2990_s1 + $0x288] ss:$12 sps:$4 sm:$0xff]  }
  0x43   :  { %1099 = vmatpush1.bf16.msra.mxu0 %v2172_v1  ;;  %1130 = vmatprep.mubr.bf16.mxu0 %v1770_v10  ;;  %v2254_v1 = vld [vmem:[%s2990_s1 + $0x300] ss:$12 sps:$4 sm:$0xff]  }
  0x44   :  { %1100 = vmatprep.subr.bf16.mxu0 %v2179_v2  ;;  %1989 = vmatprep.subr.bf16.mxu1 %v2216_v14  ;;  %v2261_v2 = vld [vmem:[%s2990_s1 + $0x31c] ss:$12 sps:$4 sm:$0xff]  }
  0x46   :  { %1990 = vmatpush3.bf16.msra.mxu1 %v2220_v18 }
  0x47   :  { %1101 = vmatpush1.bf16.msra.mxu0 %v2177_v5  ;;  %1997 = vmatprep.subr.bf16.mxu1 %v2223_v19 }
  0x48   :  { %1102 = vmatprep.subr.bf16.mxu0 %v2184_v6 }
  0x49   :  { %1294 = vmatmul.mubr.bf16.vlgmr.msra.gmra.mrb[8].mxu1 %v2653_v22 }
  0x4a   :  { %1998 = vmatpush3.bf16.msra.mxu1 %v2227_v23  ;;  %1333 = vmatprep.mubr.bf16.mxu1 %v1772_v42 }
  0x4b   :  { %1103 = vmatpush1.bf16.msra.mxu0 %v2182_v11  ;;  %1999 = vmatprep.subr.bf16.mxu1 %v2228_v24 }
  0x4c   :  { %1104 = vmatprep.subr.bf16.mxu0 %v2189_v12 }
  0x4e   :  { %2000 = vmatpush3.bf16.msra.mxu1 %v2232_v27 }
  0x4f   :  { %1105 = vmatpush1.bf16.msra.mxu0 %v2187_v16  ;;  %2001 = vmatprep.subr.bf16.mxu1 %v2233_v28 }
  0x50   :  { %1106 = vmatprep.subr.bf16.mxu0 %v2194_v17 }
  0x52   :  { %2002 = vmatpush3.bf16.msra.mxu1 %v2237_v31 }
  0x53   :  { %1107 = vmatpush1.bf16.msra.mxu0 %v2192_v20  ;;  %2003 = vmatprep.subr.bf16.mxu1 %v2238_v32 }
  0x54   :  { %1108 = vmatprep.subr.bf16.mxu0 %v2199_v21 }
  0x56   :  { %2004 = vmatpush3.bf16.msra.mxu1 %v2242_v35 }
  0x57   :  { %1109 = vmatpush1.bf16.msra.mxu0 %v2197_v25  ;;  %2005 = vmatprep.subr.bf16.mxu1 %v2243_v36 }
  0x58   :  { %1110 = vmatprep.subr.bf16.mxu0 %v2204_v26 }
  0x5a   :  { %2006 = vmatpush3.bf16.msra.mxu1 %v2247_v39 }
  0x5b   :  { %1111 = vmatpush1.bf16.msra.mxu0 %v2202_v29  ;;  %2007 = vmatprep.subr.bf16.mxu1 %v2248_v41 }
  0x5c   :  { %1112 = vmatprep.subr.bf16.mxu0 %v2209_v30 }
  0x5e   :  { %2008 = vmatpush3.bf16.msra.mxu1 %v2252_v45 }
  0x5f   :  { %1113 = vmatpush1.bf16.msra.mxu0 %v2207_v33  ;;  %2009 = vmatprep.subr.bf16.mxu1 %v2253_v46 }
  0x60   :  { %1114 = vmatprep.subr.bf16.mxu0 %v2214_v34 }
  0x62   :  { %2010 = vmatpush3.bf16.msra.mxu1 %v2257_v49 }
  0x63   :  { %1115 = vmatpush1.bf16.msra.mxu0 %v2212_v37  ;;  %2011 = vmatprep.subr.bf16.mxu1 %v2258_v50 }
  0x64   :  { %1116 = vmatprep.subr.bf16.mxu0 %v2219_v38 }
  0x66   :  { %2012 = vmatpush3.bf16.msra.mxu1 %v2262_v53 }
  0x67   :  { %1117 = vmatpush1.bf16.msra.mxu0 %v2217_v43  ;;  %2055 = vmatprep.subr.bf16.mxu1 %v2363_v58 }
  0x68   :  { %1118 = vmatprep.subr.bf16.mxu0 %v2226_v44 }
  0x69   :  { %1334 = vmatmul.mubr.bf16.vlgmr.msra.gmra.mrb[12].mxu1 %v2752_v56 }
  0x6a   :  { %2056 = vmatpush3.bf16.msra.mxu1 %v2271_v57  ;;  %2057 = vmatprep.mubr.msk.bf16.mxu1 %vm2364_vm1, %v2363_v58 }
  0x6b   :  { %1119 = vmatpush1.bf16.msra.mxu0 %v2224_v47 }
  0x6c   :  { %1120 = vmatprep.subr.bf16.mxu0 %v2231_v48 }
  0x6f   :  { %1121 = vmatpush1.bf16.msra.mxu0 %v2229_v51 }
  0x70   :  { %1122 = vmatprep.subr.bf16.mxu0 %v2236_v52 }
  0x71   :  { %2058 = vmatmul.mubr.msk.bf16.vlgmr.msra.gmra.mrb[16].mxu1 %vm1053_vm0, %v2451_v15  ;;  %v2267_v15 = vld [vmem:[%s2990_s1 + $0x334] ss:$12 sps:$4 sm:$0xff]  }
  0x73   :  { %1123 = vmatpush1.bf16.msra.mxu0 %v2234_v54 }
  0x74   :  { %1124 = vmatprep.subr.bf16.mxu0 %v2241_v55 }
  0x77   :  { %1125 = vmatpush1.bf16.msra.mxu0 %v2239_v59 }
  0x78   :  { %1126 = vmatprep.subr.bf16.mxu0 %v2246_v60 }
  0x7b   :  { %1127 = vmatpush1.bf16.msra.mxu0 %v2244_v61 }
  0x7c   :  { %1128 = vmatprep.subr.bf16.mxu0 %v2251_v62 }
  0x7f   :  { %1129 = vmatpush1.bf16.msra.mxu0 %v2249_v63 }
  0x80   :  { %1139 = vmatprep.subr.bf16.mxu0 %v2256_v0 }
  0x82   :  { %1131 = vmatmul.mubr.bf16.vlgmr.msra.gmra.mrb[0].mxu0 %v2653_v22 }
  0x83   :  { %1140 = vmatpush1.bf16.msra.mxu0 %v2254_v1  ;;  %1171 = vmatprep.mubr.bf16.mxu0 %v1772_v42 }
  0x84   :  { %1141 = vmatprep.subr.bf16.mxu0 %v2261_v2 }
  0x85   :  { %12 = vsyncpa [#allocation3], 0  ;;  %v2265_v4 = vld [vmem:[%s2990_s1 + $0x330] ss:$12 sps:$4 sm:$0xff]   ;;  %v2270_v5 = vld [vmem:[%s2990_s1 + $0x34c] ss:$12 sps:$4 sm:$0xff]   ;;  %v230_v54 = vlaneseq }
  0x86   :  { %v2268_v6 = vld [vmem:[%s2990_s1 + $0x348] ss:$12 sps:$4 sm:$0xff]   ;;  %v2274_v7 = vld [vmem:[%s2990_s1 + $0x364] ss:$12 sps:$4 sm:$0xff]   ;;  %v2272_v8 = vld [vmem:[%s2990_s1 + $0x360] ss:$12 sps:$4 sm:$0xff]  }
  0x87   :  { %1142 = vmatpush1.bf16.msra.mxu0 %v2259_v3  ;;  %v2277_v9 = vld [vmem:[%s2990_s1 + $0x37c] ss:$12 sps:$4 sm:$0xff]   ;;  %v2275_v10 = vld [vmem:[%s2990_s1 + $0x378] ss:$12 sps:$4 sm:$0xff]   ;;  %v2280_v11 = vld [vmem:[%s2990_s1 + $0x394] ss:$12 sps:$4 sm:$0xff]  }
  0x88   :  { %1143 = vmatprep.subr.bf16.mxu0 %v2267_v15  ;;  %v2278_v12 = vld [vmem:[%s2990_s1 + $0x390] ss:$12 sps:$4 sm:$0xff]   ;;  %v2283_v13 = vld [vmem:[%s2990_s1 + $0x3ac] ss:$12 sps:$4 sm:$0xff]   ;;  %v2281_v14 = vld [vmem:[%s2990_s1 + $0x3a8] ss:$12 sps:$4 sm:$0xff]  }
  0x89   :  { %v2286_v16 = vld [vmem:[%s2990_s1 + $0x3c4] ss:$12 sps:$4 sm:$0xff]   ;;  %v2284_v17 = vld [vmem:[%s2990_s1 + $0x3c0] ss:$12 sps:$4 sm:$0xff]   ;;  %v2289_v18 = vld [vmem:[%s2990_s1 + $0x3dc] ss:$12 sps:$4 sm:$0xff]  }
  0x8a   :  { %v2287_v19 = vld [vmem:[%s2990_s1 + $0x3d8] ss:$12 sps:$4 sm:$0xff]   ;;  %v2292_v20 = vld [vmem:[%s2990_s1 + $0x3f4] ss:$12 sps:$4 sm:$0xff]   ;;  %v2290_v21 = vld [vmem:[%s2990_s1 + $0x3f0] ss:$12 sps:$4 sm:$0xff]  }
  0x8b   :  { %1144 = vmatpush1.bf16.msra.mxu0 %v2265_v4  ;;  %v2295_v22 = vld [vmem:[%s2990_s1 + $0x40c] ss:$12 sps:$4 sm:$0xff]   ;;  %v2293_v23 = vld [vmem:[%s2990_s1 + $0x408] ss:$12 sps:$4 sm:$0xff]   ;;  %v2298_v24 = vld [vmem:[%s2990_s1 + $0x424] ss:$12 sps:$4 sm:$0xff]  }
  0x8c   :  { %1145 = vmatprep.subr.bf16.mxu0 %v2270_v5  ;;  %v2296_v25 = vld [vmem:[%s2990_s1 + $0x420] ss:$12 sps:$4 sm:$0xff]   ;;  %v2301_v26 = vld [vmem:[%s2990_s1 + $0x43c] ss:$12 sps:$4 sm:$0xff]   ;;  %v2299_v27 = vld [vmem:[%s2990_s1 + $0x438] ss:$12 sps:$4 sm:$0xff]  }
  0x8d   :  { %v2304_v28 = vld [vmem:[%s2990_s1 + $0x454] ss:$12 sps:$4 sm:$0xff]   ;;  %v2302_v29 = vld [vmem:[%s2990_s1 + $0x450] ss:$12 sps:$4 sm:$0xff]   ;;  %v2307_v30 = vld [vmem:[%s2990_s1 + $0x46c] ss:$12 sps:$4 sm:$0xff]  }
  0x8e   :  { %v2305_v31 = vld [vmem:[%s2990_s1 + $0x468] ss:$12 sps:$4 sm:$0xff]   ;;  %v2308_v32 = vld [vmem:[%s2992_s3 + $0x40] sm:$0xff]   ;;  %v2314_v38 = vld [vmem:[%s2992_s3 + $0x58] sm:$0xff]   ;;  %v231_v57 = vshrl.u32 %v230_v54, 7  ;;  %vm1549_vm2 = vcmask 1045504  }
  0x8f   :  { %1146 = vmatpush1.bf16.msra.mxu0 %v2268_v6  ;;  %v2309_v33 = vld [vmem:[%s2992_s3] sm:$0xff]   ;;  %v2310_v34 = vld [vmem:[%s2992_s3 + $0x48] sm:$0xff]   ;;  %2021 = vmatprep.subr.bf16.mxu1 %v2308_v32  ;;  %v2312_v36 = vld [vmem:[%s2992_s3 + $0x50] sm:$0xff]   ;;  %vm1545_vm3 = vcmask 359424   ;;  %vm1698_vm4 = vcmask 1041408   ;;  %vm1694_vm5 = vcmask 818176  }
  0x90   :  { %1147 = vmatprep.subr.bf16.mxu0 %v2274_v7  ;;  %2022 = vmatpush3.bf16.msra.mxu1 %v2309_v33  ;;  %v2311_v35 = vld [vmem:[%s2992_s3 + $0x8] sm:$0xff]   ;;  %v2313_v37 = vld [vmem:[%s2992_s3 + $0x10] sm:$0xff]   ;;  %v2315_v39 = vld [vmem:[%s2992_s3 + $0x18] sm:$0xff]   ;;  %v240_v60 = vsub.s32 2, %v231_v57 }
  0x91   :  { %2023 = vmatprep.subr.bf16.mxu1 %v2310_v34  ;;  %v2316_v40 = vld [vmem:[%s2992_s3 + $0x60] sm:$0xff]   ;;  %v2318_v42 = vld [vmem:[%s2992_s3 + $0x68] sm:$0xff]   ;;  %v2320_v53 = vld [vmem:[%s2992_s3 + $0x70] sm:$0xff]  }
  0x92   :  { %v2317_v41 = vld [vmem:[%s2992_s3 + $0x20] sm:$0xff]   ;;  %v2319_v44 = vld [vmem:[%s2992_s3 + $0x28] sm:$0xff]   ;;  %v2321_v55 = vld [vmem:[%s2992_s3 + $0x30] sm:$0xff]  }
  0x93   :  { %1148 = vmatpush1.bf16.msra.mxu0 %v2272_v8  ;;  %v2323_v59 = vld [vmem:[%s2992_s3 + $0x38] sm:$0xff]   ;;  %v228_v61 = vld [vmem:[%s2991_s2] sm:$0x7]  ;;  %v2325_v34 = vld [vmem:[%s2992_s3 + $0x88] sm:$0xff]  }
  0x94   :  { %1149 = vmatprep.subr.bf16.mxu0 %v2277_v9  ;;  %2024 = vmatpush3.bf16.msra.mxu1 %v2311_v35  ;;  %v241_v62 = vrot.slane %v228_v61, %v240_v60  ;;  %v2324_v32 = vld [vmem:[%s2992_s3 + $0x80] sm:$0xff]   ;;  %v2326_v35 = vld [vmem:[%s2992_s3 + $0x90] sm:$0x3f]  }
  0x95   :  { %2025 = vmatprep.subr.bf16.mxu1 %v2312_v36 }
  0x97   :  { %1150 = vmatpush1.bf16.msra.mxu0 %v2275_v10 }
  0x98   :  { %1151 = vmatprep.subr.bf16.mxu0 %v2280_v11  ;;  %2026 = vmatpush3.bf16.msra.mxu1 %v2313_v37  ;;  %v1551_v37 = vsel %vm1549_vm2, %v2326_v35, 0 }
  0x99   :  { %2027 = vmatprep.subr.bf16.mxu1 %v2314_v38  ;;  %v2327_v38 = vld [vmem:[%s2994_s5] sm:$0xff]  }
  0x9b   :  { %1152 = vmatpush1.bf16.msra.mxu0 %v2278_v12 }
  0x9c   :  { %1153 = vmatprep.subr.bf16.mxu0 %v2283_v13  ;;  %2028 = vmatpush3.bf16.msra.mxu1 %v2315_v39 }
  0x9d   :  { %2029 = vmatprep.subr.bf16.mxu1 %v2316_v40  ;;  %v2328_v40 = vld [vmem:[%s2994_s5 + $0x8] sm:$0xff]  }
  0x9f   :  { %1154 = vmatpush1.bf16.msra.mxu0 %v2281_v14 }
  0xa0   :  { %1155 = vmatprep.subr.bf16.mxu0 %v2286_v16  ;;  %2030 = vmatpush3.bf16.msra.mxu1 %v2317_v41  ;;  %v2329_v41 = vld [vmem:[%s2994_s5 + $0x10] sm:$0xff]  }
  0xa1   :  { %2031 = vmatprep.subr.bf16.mxu1 %v2318_v42  ;;  %v2330_v42 = vld [vmem:[%s2994_s5 + $0x18] sm:$0xff]  }
  0xa3   :  { %1156 = vmatpush1.bf16.msra.mxu0 %v2284_v17  ;;  %v232_v17 = vsub.s32 0, %v231_v57 }
  0xa4   :  { %1157 = vmatprep.subr.bf16.mxu0 %v2289_v18  ;;  %2032 = vmatpush3.bf16.msra.mxu1 %v2319_v44  ;;  %v236_v18 = vsub.s32 1, %v231_v57  ;;  %v2332_v44 = vld [vmem:[%s2994_s5 + $0x28] sm:$0xff]  }
  0xa5   :  { %2033 = vmatprep.subr.bf16.mxu1 %v2320_v53 }
  0xa7   :  { %1158 = vmatpush1.bf16.msra.mxu0 %v2287_v19  ;;  %v233_v19 = vrot.slane %v228_v61, %v232_v17 }
  0xa8   :  { %1159 = vmatprep.subr.bf16.mxu0 %v2292_v20  ;;  %2034 = vmatpush3.bf16.msra.mxu1 %v2321_v55  ;;  %v237_v20 = vrot.slane %v228_v61, %v236_v18  ;;  %v1944_v61 = vld [vmem:[%s2995_s6] ss:$0 sm:$0xff] }
  0xab   :  { %1160 = vmatpush1.bf16.msra.mxu0 %v2290_v21 }
  0xac   :  { %1161 = vmatprep.subr.bf16.mxu0 %v2295_v22 }
  0xaf   :  { %1162 = vmatpush1.bf16.msra.mxu0 %v2293_v23 }
  0xb0   :  { %1163 = vmatprep.subr.bf16.mxu0 %v2298_v24 }
  0xb3   :  { %1164 = vmatpush1.bf16.msra.mxu0 %v2296_v25 }
  0xb4   :  { %1165 = vmatprep.subr.bf16.mxu0 %v2301_v26 }
  0xb7   :  { %1166 = vmatpush1.bf16.msra.mxu0 %v2299_v27 }
  0xb8   :  { %1167 = vmatprep.subr.bf16.mxu0 %v2304_v28 }
  0xbb   :  { %1168 = vmatpush1.bf16.msra.mxu0 %v2302_v29 }
  0xbc   :  { %1169 = vmatprep.subr.bf16.mxu0 %v2307_v30 }
  0xbf   :  { %1170 = vmatpush1.bf16.msra.mxu0 %v2305_v31 }
  0xc2   :  { %1172 = vmatmul.mubr.bf16.vlgmr.msra.gmra.mrb[0].mxu0 %v2752_v56  ;;  %v2322_v56 = vld [vmem:[%s2992_s3 + $0x78] sm:$0xff]  }
  0xc3   :  { %2035 = vmatprep.subr.bf16.mxu1 %v2322_v56 }
  0xc4   :  { %2036 = vmatpush3.bf16.msra.mxu1 %v2323_v59 }
  0xc5   :  { %2061 = vmatprep.subr.bf16.mxu1 %v2363_v58 }
  0xdc   :  { %v1214_v43 = vpop.f32.mrb[0].mxu1 }
  0xdd   :  { %v1216_v45 = vpop.f32.mrb[1].mxu1 }
  0xde   :  { %v1218_v46 = vpop.f32.mrb[2].mxu1 }
  0xdf   :  { %v1219_v47 = vpop.f32.mrb[3].mxu1 }
  0xfc   :  { %v1969_v48 = vpop.f32.mrb[4].mxu1 }
  0xfd   :  { %v1970_v49 = vpop.f32.mrb[5].mxu1 }
  0xfe   :  { %v1971_v50 = vadd.f32 %v1970_v49, %v1969_v48  ;;  %v1972_v51 = vpop.f32.mrb[6].mxu1 }
  0xff   :  { %v1973_v52 = vpop.f32.mrb[7].mxu1 }
 0x100   :  { %v1256_v63 = vadd.f32 %v1971_v50, %v241_v62  ;;  %v1923_v52 = vld [vmem:[%s2993_s4] ss:$0 sm:$0xff]  ;;  %s2365_s4 = smov [#allocation2]  }
 0x101   :  { %s1759_s27 = sshll.u32 %s2365_s4, 4  ;;  %s1760_s27 = int_to_ptr.vmem [resolvable:$true] %s1759_s27 }
 0x102   :  { %s2338_s6 = scalar_lea.vmem %s1760_s27, 128  ;;  %p2343_p1 = scmp.lt.s32.totalorder %s1760_s27, %s1760_s27 }
 0x103   :  { %p2339_p0 = scmp.ne.s32.totalorder %s1760_s27, %s2338_s6  ;;  %p2344_p2 = scmp.lt.s32.totalorder %s2338_s6, %s2338_s6 }
 0x105   :  { %p2345_p3 = por %p2344_p2, %p2343_p1 }
 0x107   :  { %p2346_p4 = pnand %p2345_p3, %p2339_p0 }
 0x11c   :  { %v1991_v0 = vpop.f32.mrb[8].mxu1 }
 0x11d   :  { %v1992_v1 = vpop.f32.mrb[9].mxu1 }
 0x11e   :  { %v1993_v2 = vadd.f32 %v1992_v1, %v1991_v0  ;;  %v1994_v3 = vpop.f32.mrb[10].mxu1 }
 0x11f   :  { %v1995_v15 = vpop.f32.mrb[11].mxu1 }
 0x120   :  { %v1296_v4 = vadd.f32 %v1993_v2, %v1256_v63 }
 0x13c   :  { %v2013_v5 = vpop.f32.mrb[12].mxu1 }
 0x13d   :  { %v2014_v6 = vpop.f32.mrb[13].mxu1 }
 0x13e   :  { %v2015_v7 = vadd.f32 %v2014_v6, %v2013_v5  ;;  %v2016_v8 = vpop.f32.mrb[14].mxu1 }
 0x13f   :  { %v2017_v9 = vpop.f32.mrb[15].mxu1 }
 0x140   :  { %v1336_v10 = vadd.f32 %v2015_v7, %v1296_v4 }
 0x144   :  { %v1375_v11 = vpop.f32.mrb[16].mxu1 }
 0x145   :  { %v1376_v12 = vadd.f32 %v1375_v11, %v1336_v10  ;;  %v2059_v13 = vpop.f32.mrb[17].mxu1 }
 0x146   :  { %v1378_v14 = vpop.f32.mrb[18].mxu1 }
 0x147   :  { %v2060_v16 = vpop.f32.mrb[19].mxu1  ;;  %v1383_v36 = vmax.f32 %v1376_v12, 0.0 }
 0x149   :  { %v1386_v39 = vpack.c.bf16 %v1383_v36, %v1383_v36 }
 0x195   :  { %v1173_v21 = vpop.f32.mrb[0].mxu0 }
 0x196   :  { %v2089_v22 = vadd.f32 %v1173_v21, %v233_v19  ;;  %v1175_v23 = vpop.f32.mrb[1].mxu0 }
 0x197   :  { %v2091_v24 = vadd.f32 %v1175_v23, %v237_v20  ;;  %v1177_v25 = vpop.f32.mrb[2].mxu0 }
 0x198   :  { %v2090_v26 = vadd.f32 %v2089_v22, %v1214_v43  ;;  %v1178_v27 = vpop.f32.mrb[3].mxu0  ;;  %v2331_v43 = vld [vmem:[%s2994_s5 + $0x20] sm:$0xff]  }
 0x199   :  { %v2092_v28 = vadd.f32 %v2091_v24, %v1216_v45  ;;  %v2333_v45 = vld [vmem:[%s2994_s5 + $0x30] ss:$0 sps:$4 sm:$0x33]  }
 0x19a   :  { %v1381_v29 = vmax.f32 %v2090_v26, 0.0  ;;  %v1700_v46 = vsel %vm1698_vm4, %v2333_v45, 0 }
 0x19b   :  { %v1382_v30 = vmax.f32 %v2092_v28, 0.0 }
 0x19c   :  { %v1384_v33 = vpack.c.bf16 %v1381_v29, %v1381_v29 }
 0x19d   :  { %v1385_v31 = vpack.c.bf16 %v1382_v30, %v1382_v30 }
 0x19f   :  { %1585 = vmatprep.mubr.bf16.mxu1 %v1385_v31 }
 0x1a0   :  { %1586 = vmatmul.mubr.bf16.vlgmr.msra.gmra.mrb[20].mxu1 %v1384_v33 }
 0x1a1   :  { %2062 = vmatpush3.bf16.msra.mxu1 %v2324_v32  ;;  %2067 = vmatprep.mubr.msk.bf16.mxu1 %vm2364_vm1, %v2363_v58 }
 0x1a2   :  { %2063 = vmatprep.subr.bf16.mxu1 %v2363_v58 }
 0x1a5   :  { %2064 = vmatpush3.bf16.msra.mxu1 %v2325_v34 }
 0x1a6   :  { %2065 = vmatprep.subr.bf16.mxu1 %v2363_v58 }
 0x1a9   :  { %2066 = vmatpush3.bf16.msra.mxu1 %v1551_v37 }
 0x1aa   :  { %2071 = vmatprep.subr.bf16.mxu1 %v2363_v58 }
 0x1ac   :  { %2068 = vmatmul.mubr.msk.bf16.vlgmr.msra.gmra.mrb[24].mxu1 %vm1545_vm3, %v1386_v39 }
 0x1ad   :  { %2072 = vmatpush3.bf16.msra.mxu1 %v2327_v38  ;;  %2085 = vmatprep.mubr.msk.bf16.mxu1 %vm2364_vm1, %v2363_v58 }
 0x1ae   :  { %2073 = vmatprep.subr.bf16.mxu1 %v2363_v58 }
 0x1b1   :  { %2074 = vmatpush3.bf16.msra.mxu1 %v2328_v40 }
 0x1b2   :  { %2075 = vmatprep.subr.bf16.mxu1 %v2363_v58 }
 0x1b5   :  { %2076 = vmatpush3.bf16.msra.mxu1 %v2329_v41 }
 0x1b6   :  { %2077 = vmatprep.subr.bf16.mxu1 %v2363_v58 }
 0x1b9   :  { %2078 = vmatpush3.bf16.msra.mxu1 %v2330_v42 }
 0x1ba   :  { %2079 = vmatprep.subr.bf16.mxu1 %v2363_v58 }
 0x1bd   :  { %2080 = vmatpush3.bf16.msra.mxu1 %v2331_v43 }
 0x1be   :  { %2081 = vmatprep.subr.bf16.mxu1 %v2363_v58 }
 0x1c1   :  { %2082 = vmatpush3.bf16.msra.mxu1 %v2332_v44 }
 0x1c2   :  { %2083 = vmatprep.subr.bf16.mxu1 %v2363_v58 }
 0x1c5   :  { %2084 = vmatpush3.bf16.msra.mxu1 %v1700_v46 }
 0x273   :  { %v2037_v47 = vpop.f32.mrb[20].mxu1 }
 0x274   :  { %v2038_v48 = vpop.f32.mrb[21].mxu1 }
 0x275   :  { %v2039_v49 = vadd.f32 %v2038_v48, %v2037_v47  ;;  %v2040_v50 = vpop.f32.mrb[22].mxu1 }
 0x276   :  { %v2041_v51 = vpop.f32.mrb[23].mxu1 }
 0x277   :  { %v1588_v53 = vadd.f32 %v2039_v49, %v1923_v52 }
 0x27f   :  { %v1627_v54 = vpop.f32.mrb[24].mxu1 }
 0x280   :  { %v1628_v55 = vadd.f32 %v1627_v54, %v1588_v53  ;;  %v2069_v58 = vpop.f32.mrb[25].mxu1 }
 0x281   :  { %v1630_v56 = vpop.f32.mrb[26].mxu1 }
 0x282   :  { %v1633_v57 = vmax.f32 %v1628_v55, 0.0  ;;  %v2070_v59 = vpop.f32.mrb[27].mxu1 }
 0x284   :  { %v1634_v60 = vpack.c.bf16 %v1633_v57, %v1633_v57 }
 0x286   :  { %2086 = vmatmul.mubr.msk.bf16.vlgmr.msra.gmra.mrb[28].mxu1 %vm1694_vm5, %v1634_v60 }
 0x359   :  { %v1736_v62 = vpop.f32.mrb[28].mxu1 }
 0x35a   :  { %v1737_v63 = vadd.f32 %v1944_v61, %v1736_v62  ;;  %v2087_v0 = vpop.f32.mrb[29].mxu1 }
 0x35b   :  { %v1739_v1 = vpop.f32.mrb[30].mxu1 }
 0x35c   :  { %1742 = vmax.xlane.f32.xlu0 %v1737_v63  ;;  %v2088_v2 = vpop.f32.mrb[31].mxu1 }
 0x3e9   :  { %v1743_v3 = vpop.xlane.xlu0 %1742 }
 0x3ea   :  { %v1744_v15 = vsub.f32 %v1737_v63, %v1743_v3 }
 0x3ec   :  { %v1745_v4 = vmul.f32 1.442695, %v1744_v15 }
 0x3ee   :  { %2334 = vpow2.f32 %v1745_v4 }
 0x3f8   :  { %v2335_v5 = vpop.eup %2334 }
 0x3f9   :  { %1747 = vadd.xlane.f32.xlu0 %v2335_v5 }
 0x486   :  { %v1748_v6 = vpop.xlane.xlu0 %1747 }
 0x487   :  { %2336 = vlog2.f32 %v1748_v6 }
 0x491   :  { %v2337_v7 = vpop.eup %2336 }
 0x492   :  { %v1750_v8 = vmul.f32 0.6931472, %v2337_v7 }
 0x494   :  { %v1751_v9 = vsub.f32 %v1744_v15, %v1750_v8 }
 0x496   :  { %1752 = vst [vmem:[#allocation2] sm:$0xff] %v1751_v9 }
 0x497   :  { %2349 = shalt.err (!%p2346_p4)
}
 0x498   :  { %s2350_s29 = scalar_lea.hbm %s2996_s7, 128 }
 0x499   :  { %p2351_p5 = scmp.ne.s32.totalorder %s2996_s7, %s2350_s29  ;;  %p2354_p6 = scmp.lt.u32.totalorder %s2350_s29, %s2996_s7 }
 0x49b   :  { %p2356_p7 = pnand %p2354_p6, %p2351_p5 }
 0x49d   :  { %2359 = shalt.err (!%p2356_p7)
}
 0x49e   :  { %1762 = dma.vmem_to_hbm [thread:$0]  %s1760_s27, 128, %s2996_s7, [#allocation3]  }
 0x49f   :  { %2360 = dma.done.wait [#allocation3], 128  }
 0x4a0   :  { %2361 = vsyncadd [#allocation3], 4294967168 }
 0x4a1   :  { %1766 = vsyncpa [#allocation3], 1 }

</bundles_post_ra>
